<compile_context>
chip_gen: v5e
topology: v5e:2x2
jax: 0.10.0
libtpu: 0.0.40
codegen_flags: <defaults>
</compile_context>

<pallas_src>
import functools

import jax
import jax.numpy as jnp
from jax.experimental import pallas as pl
from jax.experimental.pallas import tpu as pltpu

LANES = 128
SUBLANES = 8
TARGET_TM = 2048  # rows per tile -> 2048*128*4B = 1 MiB per f32 input tile


def _l1_partial_sum_kernel(f_ref, r_ref, o_ref, *, tm, rows, n_inner, needs_mask):
    i = pl.program_id(1)

    @pl.when(i == 0)
    def _():
        o_ref[...] = jnp.zeros_like(o_ref)

    # Elementwise |fake - real| in the input dtype (bf16 stays bf16 on v6e/v7x),
    # accumulation in f32.
    d = jnp.abs(f_ref[...] - r_ref[...]).astype(jnp.float32)

    if needs_mask:
        # Only the globally-last row-block can be partial; zero rows >= `rows`.
        blk = pl.program_id(0) * n_inner + i
        row_ids = blk * tm + jax.lax.broadcasted_iota(jnp.int32, (tm, LANES), 0)
        d = jnp.where(row_ids < rows, d, jnp.float32(0.0))

    # Tree-reduce the (tm, 128) tile down to an (8, 128) partial: pure VPU adds
    # that co-issue under the input DMAs, accumulated into the resident output.
    o_ref[...] += d.reshape(tm // SUBLANES, SUBLANES, LANES).sum(axis=0)


def pixelwise_loss_l1(fake: jax.Array, real: jax.Array, alpha: float = 1.0) -> jax.Array:
    """alpha * mean(|fake - real|), reduction over ALL elements (nn.L1Loss default)."""
    assert fake.shape == real.shape, "fake/real must have identical shapes"
    n = fake.size

    f_flat = fake.reshape(-1)
    r_flat = real.reshape(-1)

    rows = n // LANES
    tail = n - rows * LANES

    total = jnp.float32(0.0)

    if rows >= SUBLANES:
        # Free reshape when n % 128 == 0 (the common case for image tensors);
        # otherwise only the bulk region is sliced — never a padded full copy.
        f2d = f_flat[: rows * LANES].reshape(rows, LANES)
        r2d = r_flat[: rows * LANES].reshape(rows, LANES)

        tm = min(TARGET_TM, (rows // SUBLANES) * SUBLANES)  # multiple of 8, <= rows
        n_blocks = pl.cdiv(rows, tm)
        # Shard row-blocks over 2 TensorCores (v7x megacore) when evenly splittable;
        # on 1-TC chips the outer axis is just a serial loop of length <= 2.
        n_outer = 2 if (n_blocks >= 2 and n_blocks % 2 == 0) else 1
        n_inner = n_blocks // n_outer
        needs_mask = (rows % tm) != 0

        kernel = functools.partial(
            _l1_partial_sum_kernel,
            tm=tm, rows=rows, n_inner=n_inner, needs_mask=needs_mask)

        partials = pl.pallas_call(
            kernel,
            out_shape=jax.ShapeDtypeStruct((n_outer * SUBLANES, LANES), jnp.float32),
            grid_spec=pltpu.PrefetchScalarGridSpec(
                num_scalar_prefetch=0,
                grid=(n_outer, n_inner),
                in_specs=[
                    pl.BlockSpec((tm, LANES), lambda o, i: (o * n_inner + i, 0)),
                    pl.BlockSpec((tm, LANES), lambda o, i: (o * n_inner + i, 0)),
                ],
                out_specs=pl.BlockSpec((SUBLANES, LANES), lambda o, i: (o, 0)),
            ),
            compiler_params=pltpu.CompilerParams(
                dimension_semantics=("parallel", "arbitrary")),
        )(f2d, r2d)

        total = total + jnp.sum(partials)

    if tail or rows < SUBLANES:
        # Tiny remainder (< 128 elems, or whole tensor if it has < 1024 elems):
        # handled in plain JAX to avoid padding/copying the full inputs.
        start = rows * LANES if rows >= SUBLANES else 0
        total = total + jnp.sum(
            jnp.abs(f_flat[start:].astype(jnp.float32)
                    - r_flat[start:].astype(jnp.float32)))

    mean = total / jnp.float32(n)
    return (jnp.float32(alpha) * mean).astype(jnp.float32)


if __name__ == "__main__":
    key = jax.random.PRNGKey(0)
    kf, kr = jax.random.split(key)
    # NCHW inputs, matching the PyTorch module's typical image tensors.
    fake = jax.random.normal(kf, (2, 4, 16, 16), dtype=jnp.float32)
    real = jax.random.normal(kr, (2, 4, 16, 16), dtype=jnp.float32)

    alpha = 1.0
    loss = pixelwise_loss_l1(fake, real, alpha=alpha)
    loss = jax.block_until_ready(loss)

    # Reference check in plain JAX.
    ref = alpha * jnp.mean(jnp.abs(fake - real))
    assert jnp.allclose(loss, ref, rtol=1e-6, atol=1e-6), (loss, ref)

    print("KERNEL_OK")
</pallas_src>

<mosaic_0001>
module attributes {stable_mosaic.version = 11 : i64} {
  func.func @_l1_partial_sum_kernel(%arg0: i32, %arg1: i32, %arg2: memref<16x128xf32, #tpu.memory_space<vmem>>, %arg3: memref<16x128xf32, #tpu.memory_space<vmem>>, %arg4: memref<8x128xf32, #tpu.memory_space<vmem>>) attributes {dimension_semantics = [#tpu.dimension_semantics<parallel>, #tpu.dimension_semantics<arbitrary>], iteration_bounds = array<i64: 1, 1>, scalar_prefetch = 0 : i64, scratch_operands = 0 : i64, tpu.core_type = #tpu.core_type<tc>, window_params = [{transform_indices = @transform_0, window_bounds = array<i64: 16, 128>}, {transform_indices = @transform_1, window_bounds = array<i64: 16, 128>}, {transform_indices = @transform_2, window_bounds = array<i64: 8, 128>}]} {
    %c0_i32 = arith.constant 0 : i32
    %0 = arith.cmpi eq, %arg1, %c0_i32 : i32
    %1 = arith.extui %0 : i1 to i32
    %c0_i32_0 = arith.constant 0 : i32
    %2 = arith.cmpi ne, %1, %c0_i32_0 : i32
    scf.if %2 {
      %cst_8 = arith.constant 0.000000e+00 : f32
      %12 = vector.broadcast %cst_8 : f32 to vector<8x128xf32>
      %c0_9 = arith.constant 0 : index
      %c0_10 = arith.constant 0 : index
      %13 = vector.load %arg4[%c0_9, %c0_10] : memref<8x128xf32, #tpu.memory_space<vmem>>, vector<8x128xf32>
      tpu.vector_store %arg4[%c0_9, %c0_10], %12 {strides = array<i32>} : memref<8x128xf32, #tpu.memory_space<vmem>>, vector<8x128xf32>,
    } else {
    }
    %c0 = arith.constant 0 : index
    %c0_1 = arith.constant 0 : index
    %3 = vector.load %arg2[%c0, %c0_1] : memref<16x128xf32, #tpu.memory_space<vmem>>, vector<16x128xf32>
    %c0_2 = arith.constant 0 : index
    %c0_3 = arith.constant 0 : index
    %4 = vector.load %arg3[%c0_2, %c0_3] : memref<16x128xf32, #tpu.memory_space<vmem>>, vector<16x128xf32>
    %5 = arith.subf %3, %4 : vector<16x128xf32>
    %6 = math.absf %5 : vector<16x128xf32>
    %c0_4 = arith.constant 0 : index
    %c0_5 = arith.constant 0 : index
    %7 = vector.load %arg4[%c0_4, %c0_5] : memref<8x128xf32, #tpu.memory_space<vmem>>, vector<8x128xf32>
    %8 = vector.shape_cast %6 : vector<16x128xf32> to vector<2x8x128xf32>
    %cst = arith.constant dense<0.000000e+00> : vector<8x128xf32>
    %9 = vector.multi_reduction <add>, %8, %cst [0] : vector<2x8x128xf32> to vector<8x128xf32>
    %10 = arith.addf %7, %9 : vector<8x128xf32>
    %c0_6 = arith.constant 0 : index
    %c0_7 = arith.constant 0 : index
    %11 = vector.load %arg4[%c0_6, %c0_7] : memref<8x128xf32, #tpu.memory_space<vmem>>, vector<8x128xf32>
    tpu.vector_store %arg4[%c0_6, %c0_7], %10 {strides = array<i32>} : memref<8x128xf32, #tpu.memory_space<vmem>>, vector<8x128xf32>,
    return
  }
  func.func @transform_0(%arg0: i32, %arg1: i32) -> (i32, i32) {
    %c1_i32 = arith.constant 1 : i32
    %0 = arith.muli %arg0, %c1_i32 : i32
    %1 = arith.addi %0, %arg1 : i32
    %c0_i32 = arith.constant 0 : i32
    %c0_i32_0 = arith.constant 0 : i32
    return %1, %c0_i32 : i32, i32
  }
  func.func @transform_1(%arg0: i32, %arg1: i32) -> (i32, i32) {
    %c1_i32 = arith.constant 1 : i32
    %0 = arith.muli %arg0, %c1_i32 : i32
    %1 = arith.addi %0, %arg1 : i32
    %c0_i32 = arith.constant 0 : i32
    %c0_i32_0 = arith.constant 0 : i32
    return %1, %c0_i32 : i32, i32
  }
  func.func @transform_2(%arg0: i32, %arg1: i32) -> (i32, i32) {
    %c0_i32 = arith.constant 0 : i32
    %c0_i32_0 = arith.constant 0 : i32
    return %arg0, %c0_i32 : i32, i32
  }
}

</mosaic_0001>

<bundles_post_ra>
// kernel: tpu_custom_call.1
= control target key start
LH: loop header
LB: loop body
LE: loop exit
PB: predicated region body
PF: predicated region fallthrough
CT: control target
= control target key end

     0   :  { %7 = vsyncpa [#allocation3], 0  ;;  %s204_s0 = inlined_call_operand.hbm [shape: f32[16,128], index: 0, kind: input, shape index: {}]   ;;  %s205_s1 = inlined_call_operand.hbm [shape: f32[16,128], index: 1, kind: input, shape index: {}]   ;;  %s206_s2 = inlined_call_operand.hbm [shape: f32[8,128], index: 2, kind: output, shape index: {}]  }
   0x1   :  { %8 = vsyncpa [#allocation6], 0 }
   0x2   :  { %9 = vsyncpa [#allocation4], 0  ;;  %s18_s11 = sshll.u32 %s204_s0, 4  ;;  %s175_s12 = smov [#allocation2]   ;;  %s19_s11 = int_to_ptr.hbm [resolvable:$true] %s18_s11 }
   0x3   :  { %s20_s13 = sshll.u32 %s175_s12, 4  ;;  %s35_s16 = sshll.u32 %s205_s1, 4  ;;  %s21_s13 = int_to_ptr.vmem [resolvable:$true] %s20_s13  ;;  %s36_s16 = int_to_ptr.hbm [resolvable:$true] %s35_s16 }
   0x4   :  { %s176_s17 = smov 128   ;;  %s177_s18 = smov 8  }
   0x5   :  { %26 = dma.hbm_to_vmem [thread:$0]  %s19_s11, 256, %s21_s13, [#allocation3], %s176_s17, %s176_s17, %s177_s18  }
   0x6   :  { %s178_s19 = smov [#allocation5]  }
   0x7   :  { %s37_s20 = sshll.u32 %s178_s19, 4  ;;  %s38_s20 = int_to_ptr.vmem [resolvable:$true] %s37_s20 }
   0x8   :  { %43 = dma.hbm_to_vmem [thread:$0]  %s36_s16, 256, %s38_s20, [#allocation6], %s176_s17, %s176_s17, %s177_s18  }
   0x9   :  { %169 = dma.done.wait [#allocation3], 256  }
   0xa   :  { %170 = vsyncadd [#allocation3], 4294967040 }
   0xb   :  { %171 = dma.done.wait [#allocation6], 256  }
   0xc   :  { %172 = vsyncadd [#allocation6], 4294967040  ;;  %v61_v0 = vld [vmem:[#allocation2] sm:$0xff]  ;;  %v62_v1 = vld [vmem:[#allocation2 + $0x8] sm:$0xff]  ;;  %s179_s0 = smov [#allocation7]   ;;  %s80_s23 = sshll.u32 %s206_s2, 4  ;;  %s81_s23 = int_to_ptr.hbm [resolvable:$true] %s80_s23 }
   0xd   :  { %v63_v2 = vld [vmem:[#allocation5] sm:$0xff]  ;;  %v64_v3 = vld [vmem:[#allocation5 + $0x8] sm:$0xff]  ;;  %s78_s1 = sshll.u32 %s179_s0, 4  ;;  %s79_s1 = int_to_ptr.vmem [resolvable:$true] %s78_s1 }
   0xe   :  { %v65_v4 = vsub.f32 %v61_v0, %v63_v2  ;;  %v66_v5 = vsub.f32 %v62_v1, %v64_v3 }
  0x10   :  { %v67_v6 = vand.u32 2147483647, %v65_v4  ;;  %v68_v7 = vand.u32 2147483647, %v66_v5 }
  0x12   :  { %v70_v8 = vadd.f32 %v68_v7, %v67_v6 }
  0x14   :  { %72 = vst [vmem:[#allocation7] sm:$0xff] %v70_v8 }
  0x15   :  { %83 = dma.vmem_to_hbm [thread:$0]  %s79_s1, 128, %s81_s23, [#allocation4]  }
  0x16   :  { %173 = dma.done.wait [#allocation4], 128  }
  0x17   :  { %174 = vsyncadd [#allocation4], 4294967168 }
  0x18   :  { %88 = vsyncpa [#allocation3], 1 }
  0x19   :  { %89 = vsyncpa [#allocation6], 1 }
  0x1a   :  { %90 = vsyncpa [#allocation4], 1 }

</bundles_post_ra>
